<compile_context>
chip_gen: v7x
topology: tpu7x:2x2x1
jax: 0.10.0
libtpu: 0.0.40
codegen_flags: <defaults>
</compile_context>

<pallas_src>
import functools

import jax
import jax.numpy as jnp
from jax.experimental import pallas as pl
from jax.experimental.pallas import tpu as pltpu


def _pairwise_distance_kernel(x1_ref, x2_ref, o_ref, *, p, eps):
    # Streaming, memory-bound kernel: keep the subtract in the input dtype.
    diff = x1_ref[...] - x2_ref[...]

    # Specialize the power so the hot per-element path never touches the
    # single-slot EUP (x ** float lowers through exp(p * log|x|)).
    if p == 2.0:
        d32 = diff.astype(jnp.float32)
        powed = d32 * d32                                # |x|^2 == x*x
    elif p == 1.0:
        powed = jnp.abs(diff).astype(jnp.float32)
    else:
        ad = jnp.abs(diff).astype(jnp.float32)
        powed = jnp.where(ad == 0.0, 0.0, ad ** p)       # guard 0**p (exp(p*log 0))

    s = jnp.sum(powed, axis=1, keepdims=True)            # (block_n, 1) f32 row sums

    if p == 2.0:
        res = jnp.sqrt(s + eps)
    elif p == 1.0:
        res = s + eps
    else:
        res = (s + eps) ** (1.0 / p)                     # only block_n values -> cheap

    # Lane-dense store: move per-row scalars onto the lane axis (small XLU
    # transpose) so the output store is a dense vst, not 1-lane masked stores.
    res_lane = jnp.transpose(res)                        # (1, block_n)
    o_ref[...] = res_lane.reshape(1, 1, -1).astype(o_ref.dtype)


def _pick_block_n(d, itemsize):
    """VMEM-aware row tile: pipeline holds 2 inputs x 2 double-buffers of (block_n, d)."""
    try:
        vmem_bytes = int(pltpu.get_tpu_info().vmem_capacity_bytes)
    except Exception:
        vmem_bytes = 64 * 1024 * 1024                    # conservative (v7x-sized) fallback
    # <= 1/8 of physical VMEM and <= 16 MiB for the pipelined input buffers:
    #   v5e/v6e (128 MiB VMEM) -> 16 MiB budget, v7x (64 MiB VMEM) -> 8 MiB budget.
    budget = min(vmem_bytes // 8, 16 * 1024 * 1024)
    block_n = budget // (4 * d * itemsize)               # 4 = 2 inputs * 2 pipeline buffers
    block_n = max(8, min(block_n, 4096))
    return (block_n // 8) * 8


def pairwise_distance(x1, x2, p=2.0, block_n=None):
    assert x1.shape == x2.shape, "x1 and x2 must have the same shape"
    assert x1.ndim == 2, "expected (batch, features) inputs"
    n, d = x1.shape
    eps = 0.0001 / d                                     # matches module: 1e-4 / x1.size(1)
    out_dtype = x1.dtype
    itemsize = x1.dtype.itemsize

    # ---- row-tile selection (dominant perf lever for this streaming kernel)
    if block_n is None:
        block_n = _pick_block_n(d, itemsize)
    n_round8 = ((n + 7) // 8) * 8
    block_n = min(block_n, n_round8)
    # Prefer >= 2 grid steps when the batch allows it (v7x shards a "parallel"
    # grid axis across its 2 TensorCores; harmless on v5e/v6e).
    if block_n == n_round8 and n_round8 >= 16:
        block_n = ((n_round8 // 2 + 7) // 8) * 8
    block_n = max(8, block_n)

    # ---- pad the batch so any N works with a large tile (padded rows sliced off)
    n_pad = pl.cdiv(n, block_n) * block_n
    if n_pad != n:
        x1 = jnp.pad(x1, ((0, n_pad - n), (0, 0)))
        x2 = jnp.pad(x2, ((0, n_pad - n), (0, 0)))
    num_blocks = n_pad // block_n

    # TODO(synk): for very large D, add a second ("arbitrary") grid axis over the
    # feature dim with an f32 VMEM accumulator so block_n can stay large.

    kernel = functools.partial(_pairwise_distance_kernel, p=float(p), eps=float(eps))

    cost = pl.CostEstimate(
        flops=3 * n_pad * d,
        transcendentals=(n_pad if p == 2.0 else n_pad * (d + 1)),
        bytes_accessed=2 * n_pad * d * itemsize + n_pad * itemsize,
    )

    out = pl.pallas_call(
        kernel,
        # Lane-dense output layout: (num_blocks, 1, block_n); reshaped to (N,) below.
        out_shape=jax.ShapeDtypeStruct((num_blocks, 1, block_n), out_dtype),
        grid_spec=pltpu.PrefetchScalarGridSpec(
            num_scalar_prefetch=0,
            grid=(num_blocks,),
            in_specs=[
                pl.BlockSpec((block_n, d), lambda i: (i, 0)),
                pl.BlockSpec((block_n, d), lambda i: (i, 0)),
            ],
            out_specs=pl.BlockSpec((1, 1, block_n), lambda i: (i, 0, 0)),
        ),
        compiler_params=pltpu.CompilerParams(
            dimension_semantics=("parallel",),
            vmem_limit_bytes=32 * 1024 * 1024,
        ),
        cost_estimate=cost,
    )(x1, x2)

    return out.reshape(n_pad)[:n]                        # (N,), matches torch .sum(dim=1) result


def pairwise_distance_ref(x1, x2, p=2.0):
    eps = 0.0001 / x1.shape[1]
    diff = jnp.abs(x1.astype(jnp.float32) - x2.astype(jnp.float32))
    out = jnp.sum(diff ** p, axis=1)
    return (out + eps) ** (1.0 / p)


if __name__ == "__main__":
    key = jax.random.PRNGKey(0)
    k1, k2 = jax.random.split(key)
    N, D = 20, 32                 # small (batch, hidden); N not a multiple of 8 -> exercises padding
    x1 = jax.random.normal(k1, (N, D), dtype=jnp.float32)
    x2 = jax.random.normal(k2, (N, D), dtype=jnp.float32)

    for p in (2.0, 1.0, 3.0):     # module's __init__(p); p=2 is the specialized hot case
        out = jax.block_until_ready(pairwise_distance(x1, x2, p=p))
        ref = pairwise_distance_ref(x1, x2, p=p)
        assert out.shape == (N,)
        assert out.dtype == x1.dtype
        assert jnp.allclose(out, ref.astype(out.dtype), atol=1e-5, rtol=1e-5), (p, out, ref)

    print("KERNEL_OK")
</pallas_src>

<mosaic_0001>
module attributes {stable_mosaic.version = 11 : i64} {
  func.func @_pairwise_distance_kernel(%arg0: i32, %arg1: memref<16x32xf32, #tpu.memory_space<vmem>>, %arg2: memref<16x32xf32, #tpu.memory_space<vmem>>, %arg3: memref<1x1x16xf32, #tpu.memory_space<vmem>>) attributes {dimension_semantics = [#tpu.dimension_semantics<parallel>], iteration_bounds = array<i64: 2>, scalar_prefetch = 0 : i64, scratch_operands = 0 : i64, tpu.core_type = #tpu.core_type<tc>, window_params = [{transform_indices = @transform_0, window_bounds = array<i64: 16, 32>}, {transform_indices = @transform_1, window_bounds = array<i64: 16, 32>}, {transform_indices = @transform_2, window_bounds = array<i64: 1, 1, 16>}]} {
    %c0 = arith.constant 0 : index
    %c0_0 = arith.constant 0 : index
    %0 = vector.load %arg1[%c0, %c0_0] : memref<16x32xf32, #tpu.memory_space<vmem>>, vector<16x32xf32>
    %c0_1 = arith.constant 0 : index
    %c0_2 = arith.constant 0 : index
    %1 = vector.load %arg2[%c0_1, %c0_2] : memref<16x32xf32, #tpu.memory_space<vmem>>, vector<16x32xf32>
    %2 = arith.subf %0, %1 : vector<16x32xf32>
    %3 = arith.mulf %2, %2 : vector<16x32xf32>
    %cst = arith.constant dense<0.000000e+00> : vector<16xf32>
    %4 = vector.multi_reduction <add>, %3, %cst [1] : vector<16x32xf32> to vector<16xf32>
    %5 = vector.shape_cast %4 : vector<16xf32> to vector<16x1xf32>
    %cst_3 = arith.constant 3.125000e-06 : f32
    %6 = vector.broadcast %cst_3 : f32 to vector<16x1xf32>
    %7 = arith.addf %5, %6 : vector<16x1xf32>
    %8 = math.sqrt %7 : vector<16x1xf32>
    %9 = tpu.transpose %8, [1, 0] : vector<16x1xf32> -> vector<1x16xf32>
    %10 = vector.shape_cast %9 : vector<1x16xf32> to vector<1x1x16xf32>
    %c0_4 = arith.constant 0 : index
    %c0_5 = arith.constant 0 : index
    %c0_6 = arith.constant 0 : index
    %11 = vector.load %arg3[%c0_4, %c0_5, %c0_6] : memref<1x1x16xf32, #tpu.memory_space<vmem>>, vector<1x1x16xf32>
    tpu.vector_store %arg3[%c0_4, %c0_5, %c0_6], %10 {strides = array<i32>} : memref<1x1x16xf32, #tpu.memory_space<vmem>>, vector<1x1x16xf32>,
    return
  }
  func.func @transform_0(%arg0: i32) -> (i32, i32) {
    %c0_i32 = arith.constant 0 : i32
    %c0_i32_0 = arith.constant 0 : i32
    return %arg0, %c0_i32 : i32, i32
  }
  func.func @transform_1(%arg0: i32) -> (i32, i32) {
    %c0_i32 = arith.constant 0 : i32
    %c0_i32_0 = arith.constant 0 : i32
    return %arg0, %c0_i32 : i32, i32
  }
  func.func @transform_2(%arg0: i32) -> (i32, i32, i32) {
    %c0_i32 = arith.constant 0 : i32
    %c0_i32_0 = arith.constant 0 : i32
    %c0_i32_1 = arith.constant 0 : i32
    return %arg0, %c0_i32, %c0_i32_0 : i32, i32, i32
  }
}

</mosaic_0001>

<bundles_post_ra>
// kernel: tpu_custom_call.1
= control target key start
LH: loop header
LB: loop body
LE: loop exit
PB: predicated region body
PF: predicated region fallthrough
CT: control target
= control target key end

     0   :  { %7 = vsyncpa [#allocation3], 0  ;;  %s819_s0 = inlined_call_operand.hbm [shape: f32[32,32], index: 0, kind: input, shape index: {}]   ;;  %s820_s1 = inlined_call_operand.hbm [shape: f32[32,32], index: 1, kind: input, shape index: {}]   ;;  %s821_s2 = inlined_call_operand.hbm [shape: f32[2,1,16], index: 2, kind: output, shape index: {}]  }
   0x1   :  { %9 = vsyncpa [#allocation3 + $0x1], 0 }
   0x2   :  { %10 = vsyncpa [#allocation6], 0 }
   0x3   :  { %12 = vsyncpa [#allocation6 + $0x1], 0 }
   0x4   :  { %13 = vsyncpa [#allocation4], 0 }
   0x5   :  { %15 = vsyncpa [#allocation4 + $0x1], 0  ;;  %s597_s9 = smov 0   ;;  %s599_s10 = smov 0  }
   0x6   :  { %s601_s11 = smov 0   ;;  %s603_s12 = smov 0  }
   0x7 LB: > { %s618_s13 = sadd.s32 4294967295, %s575_s12   ;;  %s370_s14 = sadd.s32 4294967294, %s575_s12   ;;  %s575_s12 = sphi %s603_s12, %s837_s12   ;;  %s571_s11 = sphi %s601_s11, %s836_s11   ;;  %s567_s10 = sphi %s599_s10, %s835_s10   ;;  %s563_s9 = sphi %s597_s9, %s834_s9  }
   0x8   : > { %s622_s15 = sadd.s32 1, %s575_s12   ;;  %s28_s16 = sadd.s32 1, %s571_s11 }
   0x9   : > { %s25_s17 = ssub.s32 %s575_s12, %s622_s15  ;;  %p35_p0 = scmp.ne.s32.totalorder %s571_s11, %s567_s10 }
   0xa   : > { %p26_p1 = scmp.eq.s32.totalorder %s25_s17, 0  ;;  %p36_p2 = scmp.eq.s32.totalorder %s575_s12, 0 }
   0xb   : > { %p41_p3 = scmp.ne.s32.totalorder %s567_s10, %s563_s9  ;;  %p42_p4 = scmp.eq.s32.totalorder %s618_s13, 0 }
   0xc   : > { %s634_s18 = scalar_select %p26_p1, %s571_s11, %s28_s16  }
   0xd   : > { %p636_p5 = por %p36_p2, %p35_p0  ;;  %p640_p6 = por %p42_p4, %p41_p3 }
   0xe   : > { %p91_p7 = scmp.eq.s32.totalorder %s618_s13, 1  ;;  %p97_p8 = scmp.eq.s32.totalorder %s370_s14, 1 }
   0xf   : > { %s825_s20 = scalar_select %p640_p6, 1, 0 }
  0x10   : > { %p404_p10 = scmp.lt.s32.totalorder %s575_s12, 2  ;;  %p647_p11 = por %p91_p7, %p35_p0 }
  0x11   : > { %p651_p12 = por %p97_p8, %p41_p3  ;;  %s656_s23 = sand.u32 1, %s571_s11  }
  0x12   : > { %s826_s21 = scalar_select %p647_p11, 1, 0 }
  0x13   : > { %s827_s22 = scalar_select %p651_p12, 1, 0 }
  0x14   : > { %s385_s24 = sshll.u32 %s575_s12, 8  ;;  %s373_s25 = sshll.u32 %s656_s23, 4 }
  0x15   : > { %s665_s28 = scalar_lea.hbm %s819_s0, %s385_s24  ;;  %s121_s29 = scalar_lea.vmem [#allocation2], %s373_s25 }
  0x16   : > { %s128_s30 = sshll.u32 %s121_s29, 4  ;;  %p671_p13 = pnand %p404_p10, %p636_p5  ;;  %s675_s30 = int_to_ptr.vmem [resolvable:$true] %s128_s30 }
  0x17   : > { %s118_s4 = scalar_lea.sflag [#allocation3], %s656_s23  ;;  %s445_s5 = scalar_lea.hbm %s665_s28, 256 }
  0x18   : > { %p446_p0 = scmp.ne.s32.totalorder %s665_s28, %s445_s5  ;;  %p447_p1 = pneg %p671_p13 }
  0x19   : > { %s450_s8 = scalar_lea.hbm %s819_s0, 512  ;;  %p451_p4 = scmp.lt.u32.totalorder %s665_s28, %s819_s0 }
  0x1a   : > { %p448_p2 = pnand %p447_p1, %p446_p0  ;;  %p452_p5 = scmp.lt.u32.totalorder %s450_s8, %s445_s5 }
  0x1b   : > { %p454_p8 = scmp.lt.u32.totalorder %s445_s5, %s665_s28 }
  0x1c   : > { %p449_p3 = pneg %p448_p2  ;;  %p453_p7 = por %p452_p5, %p451_p4 }
  0x1e   : > { %p455_p10 = por %p454_p8, %p453_p7 }
  0x20   : > { %p456_p9 = pnand %p455_p10, %p449_p3 }
  0x22   : > { %459 = shalt.err (!%p456_p9)
}
  0x23   : > { %s460_s17 = scalar_lea.vmem %s675_s30, 256  ;;  %s577_s19 = smov [#allocation2]  }
  0x24   : > { %p461_p0 = scmp.ne.s32.totalorder %s675_s30, %s460_s17  ;;  %s465_s26 = sshll.u32 %s577_s19, 4  ;;  %s466_s26 = int_to_ptr.vmem [resolvable:$false] %s465_s26 }
  0x25   : > { %s467_s27 = scalar_lea.vmem %s466_s26, 512  ;;  %p468_p11 = scmp.lt.s32.totalorder %s675_s30, %s466_s26 }
  0x26   : > { %p463_p2 = pnand %p461_p0, %p447_p1  ;;  %p469_p4 = scmp.lt.s32.totalorder %s467_s27, %s460_s17 }
  0x28   : > { %p464_p12 = pneg %p463_p2  ;;  %p470_p5 = por %p469_p4, %p468_p11 }
  0x2a   : > { %p471_p7 = pnand %p470_p5, %p464_p12 }
  0x2c   : > { %474 = shalt.err (!%p471_p7)
}
  0x2d   : > { %s578_s29 = smov 128   ;;  %s579_s5 = smov 8  }
  0x2e   : > { %396 = dma.hbm_to_vmem [thread:$0]  (!%p671_p13), %s665_s28, 256, %s675_s30, %s118_s4, %s578_s29, %s578_s29, %s579_s5  }
  0x2f   : > { %p379_p9 = scmp.ge.s32.totalorder %s575_s12, 1  ;;  %p157_p11 = scmp.lt.s32.totalorder %s575_s12, 3 }
  0x30   : > { %s719_s14 = scalar_lea.hbm %s820_s1, %s385_s24  ;;  %s142_s16 = scalar_lea.vmem [#allocation5], %s373_s25 }
  0x31   : > { %p710_p12 = pnand %p379_p9, %p157_p11  ;;  %s149_s17 = sshll.u32 %s142_s16, 4  ;;  %s723_s17 = int_to_ptr.vmem [resolvable:$true] %s149_s17 }
  0x32   : > { %s139_s28 = scalar_lea.sflag [#allocation6], %s656_s23  ;;  %s475_s30 = scalar_lea.hbm %s719_s14, 256 }
  0x33   : > { %p476_p3 = scmp.ne.s32.totalorder %s719_s14, %s475_s30  ;;  %s480_s24 = scalar_lea.hbm %s820_s1, 512 }
  0x34   : > { %p481_p0 = scmp.lt.u32.totalorder %s719_s14, %s820_s1  ;;  %p482_p2 = scmp.lt.u32.totalorder %s480_s24, %s475_s30 }
  0x35   : > { %p478_p8 = pnand %p476_p3, %p447_p1  ;;  %p484_p5 = scmp.lt.u32.totalorder %s475_s30, %s719_s14 }
  0x36   : > { %p483_p4 = por %p482_p2, %p481_p0 }
  0x37   : > { %p479_p10 = pneg %p478_p8 }
  0x38   : > { %p485_p7 = por %p484_p5, %p483_p4 }
  0x3a   : > { %p486_p9 = pnand %p485_p7, %p479_p10 }
  0x3c   : > { %489 = shalt.err (!%p486_p9)
}
  0x3d   : > { %s490_s25 = scalar_lea.vmem %s723_s17, 256  ;;  %s580_s7 = smov [#allocation5]  }
  0x3e   : > { %p491_p11 = scmp.ne.s32.totalorder %s723_s17, %s490_s25  ;;  %s495_s8 = sshll.u32 %s580_s7, 4  ;;  %s496_s8 = int_to_ptr.vmem [resolvable:$false] %s495_s8 }
  0x3f   : > { %s497_s16 = scalar_lea.vmem %s496_s8, 512  ;;  %p498_p6 = scmp.lt.s32.totalorder %s723_s17, %s496_s8 }
  0x40   : > { %p493_p3 = pnand %p491_p11, %p447_p1  ;;  %p499_p0 = scmp.lt.s32.totalorder %s497_s16, %s490_s25 }
  0x42   : > { %p494_p8 = pneg %p493_p3  ;;  %p500_p2 = por %p499_p0, %p498_p6 }
  0x44   : > { %p501_p4 = pnand %p500_p2, %p494_p8 }
  0x46   : > { %504 = shalt.err (!%p501_p4)
}
  0x47   : > { %399 = dma.hbm_to_vmem [thread:$0]  (!%p671_p13), %s719_s14, 256, %s723_s17, %s139_s28, %s578_s29, %s578_s29, %s579_s5  }
  0x48   : > { %161 = sbr.rel (%p710_p12) target bundleno = 391 (0x187), region = 28  ;;  %s757_s30 = sand.u32 (!%p710_p12), 1, %s567_s10  }
  0x49   : > { %s380_s4 = sshll.u32 (!%p710_p12), %s757_s30, 4  ;;  %s164_s19 = scalar_lea.sflag (!%p710_p12), [#allocation3], %s757_s30 }
  0x4a   : > { %s167_s3 = scalar_lea.vmem (!%p710_p12), [#allocation2], %s380_s4  ;;  %p830_p6 = scmp.ne.s32.totalorder (!%p710_p12), %s825_s20, 0 }
  0x4f   : > { %550 = dma.done.wait (%p830_p6), %s164_s19, 256  }
  0x50   : > { %552 = vsyncadd (%p830_p6), %s164_s19, 4294967040  ;;  %s173_s23 = scalar_lea.sflag [#allocation6], %s757_s30  ;;  %s176_s29 = scalar_lea.vmem [#allocation5], %s380_s4 }
  0x51   : > { %554 = dma.done.wait (%p830_p6), %s173_s23, 256  }
  0x52   : > { %556 = vsyncadd (%p830_p6), %s173_s23, 4294967040  ;;  %v203_v0 = vld [vmem:[%s167_s3] sm:$0xff]  ;;  %v204_v2 = vld [vmem:[%s167_s3 + $0x8] sm:$0xff]  ;;  %vm211_vm0 = vcmask 261120   ;;  %s382_s20 = sshll.u32 %s618_s13, 4  ;;  %s200_s5 = scalar_lea.vmem [#allocation7], %s757_s30 }
  0x53   : > { %v205_v1 = vld [vmem:[%s176_s29] sm:$0xff]  ;;  %v206_v4 = vld [vmem:[%s176_s29 + $0x8] sm:$0xff]  ;;  %s281_s6 = sshll.u32 %s200_s5, 4  ;;  %vm266_vm5 = vcmask 122880   ;;  %s775_s28 = scalar_lea.hbm %s821_s2, %s382_s20  ;;  %s777_s6 = int_to_ptr.vmem [resolvable:$true] %s281_s6 }
  0x54   : > { %v207_v3 = vsub.f32 %v203_v0, %v205_v1  ;;  %v208_v5 = vsub.f32 %v204_v2, %v206_v4  ;;  %s269_s24 = scalar_lea.sflag [#allocation4], %s757_s30  ;;  %s505_s26 = scalar_lea.vmem %s777_s6, 16 }
  0x55   : > { %p506_p13 = scmp.ne.s32.totalorder %s777_s6, %s505_s26  ;;  %p831_p1 = scmp.ne.s32.totalorder %s826_s21, 0 }
  0x56   : > { %v209_v6 = vmul.f32 %v207_v3, %v207_v3  ;;  %v210_v7 = vmul.f32 %v208_v5, %v208_v5  ;;  %s581_s13 = smov [#allocation7]  }
  0x57   : > { %p507_p12 = pnand %p506_p13, %p831_p1  ;;  %s509_s27 = sshll.u32 %s581_s13, 4  ;;  %s510_s27 = int_to_ptr.vmem [resolvable:$false] %s509_s27 }
  0x58   : > { %v212_v8 = vsel %vm211_vm0, %v209_v6, 0.0  ;;  %v215_v9 = vsel %vm211_vm0, %v210_v7, 0.0  ;;  %s511_s25 = scalar_lea.vmem %s510_s27, 32  ;;  %p512_p5 = scmp.lt.s32.totalorder %s777_s6, %s510_s27 }
  0x59   : > { %213 = vadd.xlane.f32.xlu0 %v212_v8  ;;  %p508_p10 = pneg %p507_p12  ;;  %p513_p7 = scmp.lt.s32.totalorder %s511_s25, %s505_s26 }
  0x5b   : > { %p514_p9 = por %p513_p7, %p512_p5 }
  0x5d   : > { %216 = vadd.xlane.f32.xlu0 %v215_v9  ;;  %p515_p11 = pnand %p514_p9, %p508_p10 }
  0xe6   : > { %v214_v10 = vpop.xlane.xlu0 %213 }
  0xe7   : > { %v218_v11 = vadd.f32 3.125e-06, %v214_v10 }
  0xe9   : > { %441 = vrsqrt.f32 %v218_v11  ;;  %vm222_vm1 = vcmp.eq.f32.partialorder %v218_v11, inf  ;;  %v225_v16 = vand.u32 2147483648, %v218_v11  ;;  %vm224_vm2 = vcmp.eq.f32.partialorder %v218_v11, 0.0 }
  0xea   : > { %v217_v12 = vpop.xlane.xlu0 %216 }
  0xeb   : > { %v219_v13 = vadd.f32 3.125e-06, %v217_v12 }
  0xed   : > { %443 = vrsqrt.f32 %v219_v13  ;;  %vm229_vm3 = vcmp.eq.f32.partialorder %v219_v13, inf  ;;  %v232_v21 = vand.u32 2147483648, %v219_v13  ;;  %vm231_vm4 = vcmp.eq.f32.partialorder %v219_v13, 0.0 }
  0xf3   : > { %v442_v14 = vpop.eup %441 }
  0xf4   : > { %v221_v15 = vmul.f32 %v442_v14, %v218_v11 }
  0xf6   : > { %v223_v17 = vsel %vm222_vm1, %v218_v11, %v221_v15 }
  0xf7   : > { %v444_v18 = vpop.eup %443  ;;  %v226_v19 = vsel %vm224_vm2, %v225_v16, %v223_v17 }
  0xf8   : > { %234 = vxpose.xlu1.b32.start [1/2] (short) (narrow) %v226_v19, 8  ;;  %v228_v20 = vmul.f32 %v444_v18, %v219_v13 }
  0xfa   : > { %v230_v22 = vsel %vm229_vm3, %v219_v13, %v228_v20 }
  0xfb   : > { %v233_v23 = vsel %vm231_vm4, %v232_v21, %v230_v22 }
  0xfc   : > { %235 = vxpose.xlu1.b32.end [2/2] (short) (narrow) %v233_v23, 8 }
 0x178   : > { %v250_v24 = vpop.trf.xlu1 }
 0x179   : > { %267 = vst.msk [vmem:[%s200_s5] sm:$0x1] %vm266_vm5, %v250_v24 }
 0x17a   : > { %518 = shalt.err (!%p515_p11)
}
 0x17b   : > { %s519_s7 = scalar_lea.hbm %s775_s28, 16  ;;  %s523_s30 = scalar_lea.hbm %s821_s2, 32 }
 0x17c   : > { %p520_p3 = scmp.ne.s32.totalorder %s775_s28, %s519_s7  ;;  %p524_p2 = scmp.lt.u32.totalorder %s775_s28, %s821_s2 }
 0x17d   : > { %p525_p4 = scmp.lt.u32.totalorder %s523_s30, %s519_s7  ;;  %p527_p13 = scmp.lt.u32.totalorder %s519_s7, %s775_s28 }
 0x17e   : > { %p521_p8 = pnand %p520_p3, %p831_p1 }
 0x17f   : > { %p526_p6 = por %p525_p4, %p524_p2 }
 0x180   : > { %p522_p0 = pneg %p521_p8 }
 0x181   : > { %p528_p12 = por %p527_p13, %p526_p6 }
 0x183   : > { %p529_p10 = pnand %p528_p12, %p522_p0 }
 0x185   : > { %532 = shalt.err (!%p529_p10)
}
 0x186   : > { %391 = dma.vmem_to_hbm [thread:$0]  (%p831_p1), %s777_s6, 16, %s775_s28, %s269_s24  }
 0x187 PF: > { %s293_s3 = sand.u32 1, %s563_s9   ;;  %p832_p5 = scmp.ne.s32.totalorder %s827_s22, 0 }
 0x188   : > { %p833_p7 = scmp.ge.s32.totalorder %s575_s12, 2  ;;  %s294_s23 = scalar_lea.sflag [#allocation4], %s293_s3 }
 0x18a   : > { %p401_p9 = pnand %p833_p7, %p832_p5 }
 0x18c   : > { %558 = dma.done.wait (!%p401_p9), %s294_s23, 16  }
 0x18d   : > { %560 = vsyncadd (!%p401_p9), %s294_s23, 4294967280  ;;  %p18_p11 = scmp.ge.s32.totalorder %s622_s15, 4   ;;  %s834_s9 = smov %s567_s10 }
 0x18e   : > { %s835_s10 = smov %s571_s11  ;;  %s836_s11 = smov %s634_s18 }
 0x18f   : > { %s837_s12 = smov %s622_s15  ;;  %20 = sbr.rel (!%p18_p11) target bundleno = 7 (0x7), region = 86 }
 0x196   :  { %298 = vsyncpa [#allocation3], 1 }
 0x197   :  { %300 = vsyncpa [#allocation3 + $0x1], 1 }
 0x198   :  { %301 = vsyncpa [#allocation6], 1 }
 0x199   :  { %303 = vsyncpa [#allocation6 + $0x1], 1 }
 0x19a   :  { %304 = vsyncpa [#allocation4], 1 }
 0x19b   :  { %306 = vsyncpa [#allocation4 + $0x1], 1 }

</bundles_post_ra>
